<compile_context>
chip_gen: v5e
topology: v5e:2x2
jax: 0.10.0
libtpu: 0.0.40
codegen_flags: <defaults>
</compile_context>

<pallas_src>
import numpy as np

import jax
import jax.numpy as jnp
from jax import lax
from jax.experimental import pallas as pl
from jax.experimental.pallas import tpu as pltpu


def _round_up(x, m):
    return ((x + m - 1) // m) * m


def _vmem_budget():
    """Generation-aware (per-step working-set budget, Mosaic vmem limit)."""
    cap = None
    try:
        cap = getattr(pltpu.get_tpu_info(), "vmem_capacity_bytes", None)
    except Exception:
        cap = None
    if cap is None:
        cap = 64 * 1024 * 1024
    if cap >= 100 * 1024 * 1024:                 # v5e / v6e: 128 MiB VMEM
        return 12 * 1024 * 1024, 64 * 1024 * 1024
    return 5 * 1024 * 1024, 32 * 1024 * 1024     # v7x: 64 MiB VMEM


def _make_fused_kernel(offsets, full_taps, L):
    """One fused (pointwise x depthwise) MXU matmul per grid step.

    x_ref   : (C_in_pad, L)          L = B_TILE * HW_pad (batch fused on lanes)
    w_ref   : (CO_T, KK*C_in_pad)    combined pw*dw weights
    mask_ref: (KK, L)                0/1 boundary masks in x.dtype
    o_ref   : (CO_T, L)              lane-dense output
    Invariant: every lane whose roll wraps across an image (or HW padding)
    boundary is zeroed by its per-tap mask, so a single roll on the fused lane
    axis is exact.
    """

    def kernel(x_ref, w_ref, mask_ref, o_ref):
        x2 = x_ref[...]
        patches = []
        for t, off in enumerate(offsets):
            shift = (-off) % L
            shifted = pltpu.roll(x2, shift, 1) if shift else x2
            if not full_taps[t]:
                shifted = shifted * mask_ref[t:t + 1, :]     # 1 VPU mul per tap
            patches.append(shifted)
        # Sublane-aligned append (C_in_pad is a packing multiple): free layout.
        im2col = jnp.concatenate(patches, axis=0)            # (KK*C_in_pad, L)
        out = jnp.dot(w_ref[...], im2col, preferred_element_type=jnp.float32)
        o_ref[...] = out.astype(o_ref.dtype)

    return kernel


def _make_two_stage_kernel(offsets, full_taps, L):
    """Wide-C_in path: depthwise as VPU accumulate, then one pointwise matmul.

    x_ref : (C_in_pad, L); dw_ref: (C_in_pad, KK) f32; pw_ref: (CO_T, C_in_pad)
    """

    def kernel(x_ref, dw_ref, pw_ref, mask_ref, o_ref):
        x2 = x_ref[...]
        acc = jnp.zeros(x2.shape, jnp.float32)
        for t, off in enumerate(offsets):
            shift = (-off) % L
            shifted = pltpu.roll(x2, shift, 1) if shift else x2
            if not full_taps[t]:
                shifted = shifted * mask_ref[t:t + 1, :]
            acc = acc + shifted.astype(jnp.float32) * dw_ref[:, t:t + 1]
        mid = acc.astype(x2.dtype)                           # intermediate in x.dtype
        out = jnp.dot(pw_ref[...], mid, preferred_element_type=jnp.float32)
        o_ref[...] = out.astype(o_ref.dtype)

    return kernel


def dil_conv(x, dw_weight, pw_weight, *, stride, padding, dilation):
    """DilConv forward (NCHW): depthwise dilated KxK conv (groups=C_in, no bias)
    followed by a pointwise 1x1 conv (no bias).

    x: (N, C_in, H, W); dw_weight: (C_in, K, K); pw_weight: (C_out, C_in).
    """
    N, C_in, H, W = x.shape
    K = dw_weight.shape[-1]
    KK = K * K
    C_out = pw_weight.shape[0]
    its = x.dtype.itemsize

    H_out = (H + 2 * padding - dilation * (K - 1) - 1) // stride + 1
    W_out = (W + 2 * padding - dilation * (K - 1) - 1) // stride + 1

    # "Same"-geometry (DARTS dil_conv_3x3 / 5x5): no wrapper pad, in-kernel
    # masks emulate the zero padding.  Otherwise fold the padding into one
    # wrapper pad and run the kernel with padding 0, cropping afterwards.
    same_geom = (2 * padding == dilation * (K - 1))
    if same_geom:
        x_work = x
        pad_eff = padding
    else:
        x_work = jnp.pad(x, ((0, 0), (0, 0),
                             (padding, padding), (padding, padding)))
        pad_eff = 0
    H_full, W_full = x_work.shape[-2], x_work.shape[-1]
    HW = H_full * W_full
    HW_pad = _round_up(HW, 128)           # lane-dense stores, aligned rolls

    sub = max(8, 32 // its)               # sublane packing: 8 f32 / 16 bf16 / 32 i8
    C_in_pad = _round_up(C_in, sub)

    # C_out tiling: prefer tiles that divide C_out exactly (no zero-padded MXU
    # rows, no post-slice HBM pass); fall back to padding to a 128 multiple.
    if C_out <= 256:
        CO_T, C_out_pad = C_out, C_out
    else:
        CO_T = next((t for t in (256, 128, 64) if C_out % t == 0), 0)
        if CO_T:
            C_out_pad = C_out
        else:
            CO_T, C_out_pad = 128, _round_up(C_out, 128)
    co_tiles = C_out_pad // CO_T

    # Gate the pw*dw fusion: fused contraction KK*C_in_pad must fit one MXU
    # pass (256-deep on v6e/v7x; crossover is earlier on v5e's 128-deep MXU).
    use_fused = (KK * C_in_pad) <= 256

    budget, vmem_limit = _vmem_budget()
    if use_fused:
        per_img = HW_pad * (2 * C_in_pad * its + 2 * CO_T * its + 2 * KK * its
                            + 2 * KK * C_in_pad * its + 4 * CO_T)
    else:
        per_img = HW_pad * (2 * C_in_pad * its + 2 * CO_T * its + 2 * KK * its
                            + 4 * C_in_pad + 2 * C_in_pad * its + 4 * CO_T)
    B_TILE = 1
    for d in range(1, min(N, 8) + 1):
        if N % d == 0 and d * per_img <= budget:
            B_TILE = d
    # Guarantee >=2 grid steps so both v7x TensorCores get work (cheap elsewhere).
    if (N // B_TILE) * co_tiles < 2 and N >= 2:
        for d in range(B_TILE - 1, 0, -1):
            if N % d == 0 and N // d >= 2:
                B_TILE = d
                break
    n_tiles = N // B_TILE
    L = B_TILE * HW_pad

    # Per-tap lane offsets and boundary masks (trace-time constants).  Masks are
    # tiled over B_TILE so a single roll on the fused lane axis stays correct:
    # every lane that would wrap across an image boundary is zeroed by its mask.
    rows = np.arange(H_full).reshape(-1, 1)
    cols = np.arange(W_full).reshape(1, -1)
    offsets, full_taps = [], []
    mask_img = np.zeros((KK, HW_pad), np.float32)
    t = 0
    for kh in range(K):
        for kw in range(K):
            dh = kh * dilation - pad_eff
            dw_ = kw * dilation - pad_eff
            offsets.append(dh * W_full + dw_)
            valid = ((rows + dh >= 0) & (rows + dh < H_full)
                     & (cols + dw_ >= 0) & (cols + dw_ < W_full))
            mask_img[t, :HW] = valid.reshape(-1)
            full_taps.append(bool(valid.all()))   # full => off == 0 => no wrap
            t += 1
    masks = jnp.asarray(np.tile(mask_img, (1, B_TILE)), dtype=x.dtype)

    # Activations as (C_in_pad, N*HW_pad): channels on sublanes, batch*spatial
    # fused on the lane axis (one wide MXU matmul per grid step).
    x_lin = x_work.reshape(N, C_in, HW).transpose(1, 0, 2)
    x_lin = jnp.pad(x_lin, ((0, C_in_pad - C_in), (0, 0), (0, HW_pad - HW)))
    x_lin = x_lin.reshape(C_in_pad, N * HW_pad)

    dw_p = jnp.pad(dw_weight.astype(jnp.float32),
                   ((0, C_in_pad - C_in), (0, 0), (0, 0)))
    pw_p = jnp.pad(pw_weight.astype(jnp.float32),
                   ((0, C_out_pad - C_out), (0, C_in_pad - C_in)))

    # True DilConv cost (not the fused KK-inflated FLOP count).
    cost = pl.CostEstimate(
        flops=2 * N * H_out * W_out * C_in * (KK + C_out),
        transcendentals=0,
        bytes_accessed=int(x_lin.size * its
                           + C_out_pad * KK * C_in_pad * its
                           + C_out_pad * N * HW_pad * its))

    # Grid ordering: keep whichever operand stream is larger resident across the
    # inner axis (Pallas skips the re-DMA when a block index repeats), so we do
    # not re-read the weight tile n_tiles times on weight-heavy layers.
    w_bytes = (C_out_pad * KK * C_in_pad * its if use_fused
               else C_out_pad * C_in_pad * its)
    x_bytes = x_lin.size * its
    if n_tiles * w_bytes <= co_tiles * x_bytes:
        grid = (n_tiles, co_tiles)            # batch outer, C_out inner
        bidx = lambda a, b: a
        cidx = lambda a, b: b
    else:
        grid = (co_tiles, n_tiles)            # C_out outer (weights resident)
        bidx = lambda a, b: b
        cidx = lambda a, b: a

    x_spec = pl.BlockSpec((C_in_pad, L), lambda a, b: (0, bidx(a, b)))
    mask_spec = pl.BlockSpec((KK, L), lambda a, b: (0, 0))
    out_spec = pl.BlockSpec((CO_T, L), lambda a, b: (cidx(a, b), bidx(a, b)))
    out_shape = jax.ShapeDtypeStruct((C_out_pad, N * HW_pad), x.dtype)
    cparams = pltpu.CompilerParams(
        dimension_semantics=("parallel", "parallel"),
        vmem_limit_bytes=vmem_limit)

    if use_fused:
        taps = dw_p.reshape(C_in_pad, KK).T                      # (KK, C_in_pad)
        w_comb = (pw_p[:, None, :] * taps[None, :, :]).reshape(
            C_out_pad, KK * C_in_pad).astype(x.dtype)
        kernel = _make_fused_kernel(tuple(offsets), tuple(full_taps), L)
        w_spec = pl.BlockSpec((CO_T, KK * C_in_pad),
                              lambda a, b: (cidx(a, b), 0))
        out_lin = pl.pallas_call(
            kernel,
            out_shape=out_shape,
            grid_spec=pltpu.PrefetchScalarGridSpec(
                num_scalar_prefetch=0, grid=grid,
                in_specs=[x_spec, w_spec, mask_spec],
                out_specs=out_spec),
            compiler_params=cparams,
            cost_estimate=cost,
        )(x_lin, w_comb, masks)
    else:
        dw_mat = dw_p.reshape(C_in_pad, KK)                      # f32
        pw_mat = pw_p.astype(x.dtype)                            # (C_out_pad, C_in_pad)
        kernel = _make_two_stage_kernel(tuple(offsets), tuple(full_taps), L)
        dw_spec = pl.BlockSpec((C_in_pad, KK), lambda a, b: (0, 0))
        pw_spec = pl.BlockSpec((CO_T, C_in_pad), lambda a, b: (cidx(a, b), 0))
        out_lin = pl.pallas_call(
            kernel,
            out_shape=out_shape,
            grid_spec=pltpu.PrefetchScalarGridSpec(
                num_scalar_prefetch=0, grid=grid,
                in_specs=[x_spec, dw_spec, pw_spec, mask_spec],
                out_specs=out_spec),
            compiler_params=cparams,
            cost_estimate=cost,
        )(x_lin, dw_mat, pw_mat, masks)

    # Free row-major reshapes + one transpose back to NCHW (done here so the
    # kernel's stores stay lane-dense).
    y = out_lin.reshape(C_out_pad, N, HW_pad)[:C_out, :, :HW]
    y = y.reshape(C_out, N, H_full, W_full).transpose(1, 0, 2, 3)
    if stride > 1 or H_full != H_out or W_full != W_out:
        # TODO(synk): for stride>1, compute only the needed output phases inside
        # the kernel (phase-split im2col) instead of dense-compute + subsample.
        y = y[:, :, :(H_out - 1) * stride + 1:stride,
                    :(W_out - 1) * stride + 1:stride]
    return y


def _reference(x, dw_weight, pw_weight, *, stride, padding, dilation):
    C_in = x.shape[1]
    C_out = pw_weight.shape[0]
    K = dw_weight.shape[-1]
    dn = ("NCHW", "OIHW", "NCHW")
    y = lax.conv_general_dilated(
        x, dw_weight.reshape(C_in, 1, K, K),
        window_strides=(stride, stride),
        padding=[(padding, padding), (padding, padding)],
        rhs_dilation=(dilation, dilation),
        feature_group_count=C_in,
        dimension_numbers=dn)
    y = lax.conv_general_dilated(
        y, pw_weight.reshape(C_out, C_in, 1, 1),
        window_strides=(1, 1), padding=[(0, 0), (0, 0)],
        dimension_numbers=dn)
    return y


if __name__ == "__main__":
    key = jax.random.PRNGKey(0)

    # (N, C_in, C_out, H, W, K, stride, padding, dilation)
    configs = [
        (4, 4, 8, 16, 16, 3, 1, 2, 2),     # DARTS dil_conv_3x3 (fused, B_TILE=2)
        (2, 4, 8, 16, 16, 5, 1, 4, 2),     # DARTS dil_conv_5x5 (fused)
        (2, 4, 8, 16, 16, 3, 2, 2, 2),     # reduction-cell stride-2 variant
        (2, 36, 36, 8, 8, 3, 1, 2, 2),     # wide C_in -> two-stage, HW padded
        (2, 4, 8, 16, 16, 3, 1, 1, 2),     # non-"same" geometry (wrapper pad)
    ]

    for (N, C_in, C_out, H, W, K, stride, padding, dilation) in configs:
        kx, kdw, kpw, key = jax.random.split(key, 4)
        x = jax.random.normal(kx, (N, C_in, H, W), dtype=jnp.float32)
        # PyTorch depthwise weight (C_in, 1, K, K) -> stored as (C_in, K, K)
        dw_weight = jax.random.normal(kdw, (C_in, K, K), dtype=jnp.float32) * 0.1
        # PyTorch pointwise weight (C_out, C_in, 1, 1) -> stored as (C_out, C_in)
        pw_weight = jax.random.normal(kpw, (C_out, C_in), dtype=jnp.float32) * 0.1

        out = dil_conv(x, dw_weight, pw_weight,
                       stride=stride, padding=padding, dilation=dilation)
        out = jax.block_until_ready(out)

        ref = _reference(x, dw_weight, pw_weight,
                         stride=stride, padding=padding, dilation=dilation)
        assert out.shape == ref.shape, (out.shape, ref.shape)
        err = float(jnp.max(jnp.abs(out - ref)))
        assert jnp.allclose(out, ref, atol=1e-4, rtol=1e-4), (
            f"mismatch for K={K}, stride={stride}, padding={padding}: "
            f"max abs err {err:.3e}")

    print("KERNEL_OK")
</pallas_src>

<mosaic_0001>
module attributes {stable_mosaic.version = 11 : i64} {
  func.func @kernel(%arg0: i32, %arg1: i32, %arg2: memref<8x512xf32, #tpu.memory_space<vmem>>, %arg3: memref<8x72xf32, #tpu.memory_space<vmem>>, %arg4: memref<9x512xf32, #tpu.memory_space<vmem>>, %arg5: memref<8x512xf32, #tpu.memory_space<vmem>>) attributes {dimension_semantics = [#tpu.dimension_semantics<parallel>, #tpu.dimension_semantics<parallel>], iteration_bounds = array<i64: 2, 1>, scalar_prefetch = 0 : i64, scratch_operands = 0 : i64, tpu.core_type = #tpu.core_type<tc>, window_params = [{transform_indices = @transform_0, window_bounds = array<i64: 8, 512>}, {transform_indices = @transform_1, window_bounds = array<i64: 8, 72>}, {pipeline_mode = #tpu.pipeline_mode<synchronous>, transform_indices = @transform_2, window_bounds = array<i64: 9, 512>}, {transform_indices = @transform_3, window_bounds = array<i64: 8, 512>}]} {
    %c0 = arith.constant 0 : index
    %c0_0 = arith.constant 0 : index
    %0 = vector.load %arg2[%c0, %c0_0] : memref<8x512xf32, #tpu.memory_space<vmem>>, vector<8x512xf32>
    %c34_i32 = arith.constant 34 : i32
    %1 = tpu.dynamic_rotate %0 by %c34_i32 dim 1 : vector<8x512xf32>, i32 -> vector<8x512xf32>
    %c0_1 = arith.constant 0 : index
    %c0_2 = arith.constant 0 : index
    %2 = vector.load %arg4[%c0_1, %c0_2] : memref<9x512xf32, #tpu.memory_space<vmem>>, vector<1x512xf32>
    %3 = vector.broadcast %2 : vector<1x512xf32> to vector<8x512xf32>
    %4 = arith.mulf %1, %3 : vector<8x512xf32>
    %c32_i32 = arith.constant 32 : i32
    %5 = tpu.dynamic_rotate %0 by %c32_i32 dim 1 : vector<8x512xf32>, i32 -> vector<8x512xf32>
    %c1 = arith.constant 1 : index
    %c0_3 = arith.constant 0 : index
    %6 = vector.load %arg4[%c1, %c0_3] : memref<9x512xf32, #tpu.memory_space<vmem>>, vector<1x512xf32>
    %7 = vector.broadcast %6 : vector<1x512xf32> to vector<8x512xf32>
    %8 = arith.mulf %5, %7 : vector<8x512xf32>
    %c30_i32 = arith.constant 30 : i32
    %9 = tpu.dynamic_rotate %0 by %c30_i32 dim 1 : vector<8x512xf32>, i32 -> vector<8x512xf32>
    %c2 = arith.constant 2 : index
    %c0_4 = arith.constant 0 : index
    %10 = vector.load %arg4[%c2, %c0_4] : memref<9x512xf32, #tpu.memory_space<vmem>>, vector<1x512xf32>
    %11 = vector.broadcast %10 : vector<1x512xf32> to vector<8x512xf32>
    %12 = arith.mulf %9, %11 : vector<8x512xf32>
    %c2_i32 = arith.constant 2 : i32
    %13 = tpu.dynamic_rotate %0 by %c2_i32 dim 1 : vector<8x512xf32>, i32 -> vector<8x512xf32>
    %c3 = arith.constant 3 : index
    %c0_5 = arith.constant 0 : index
    %14 = vector.load %arg4[%c3, %c0_5] : memref<9x512xf32, #tpu.memory_space<vmem>>, vector<1x512xf32>
    %15 = vector.broadcast %14 : vector<1x512xf32> to vector<8x512xf32>
    %16 = arith.mulf %13, %15 : vector<8x512xf32>
    %c510_i32 = arith.constant 510 : i32
    %17 = tpu.dynamic_rotate %0 by %c510_i32 dim 1 : vector<8x512xf32>, i32 -> vector<8x512xf32>
    %c5 = arith.constant 5 : index
    %c0_6 = arith.constant 0 : index
    %18 = vector.load %arg4[%c5, %c0_6] : memref<9x512xf32, #tpu.memory_space<vmem>>, vector<1x512xf32>
    %19 = vector.broadcast %18 : vector<1x512xf32> to vector<8x512xf32>
    %20 = arith.mulf %17, %19 : vector<8x512xf32>
    %c482_i32 = arith.constant 482 : i32
    %21 = tpu.dynamic_rotate %0 by %c482_i32 dim 1 : vector<8x512xf32>, i32 -> vector<8x512xf32>
    %c6 = arith.constant 6 : index
    %c0_7 = arith.constant 0 : index
    %22 = vector.load %arg4[%c6, %c0_7] : memref<9x512xf32, #tpu.memory_space<vmem>>, vector<1x512xf32>
    %23 = vector.broadcast %22 : vector<1x512xf32> to vector<8x512xf32>
    %24 = arith.mulf %21, %23 : vector<8x512xf32>
    %c480_i32 = arith.constant 480 : i32
    %25 = tpu.dynamic_rotate %0 by %c480_i32 dim 1 : vector<8x512xf32>, i32 -> vector<8x512xf32>
    %c7 = arith.constant 7 : index
    %c0_8 = arith.constant 0 : index
    %26 = vector.load %arg4[%c7, %c0_8] : memref<9x512xf32, #tpu.memory_space<vmem>>, vector<1x512xf32>
    %27 = vector.broadcast %26 : vector<1x512xf32> to vector<8x512xf32>
    %28 = arith.mulf %25, %27 : vector<8x512xf32>
    %c478_i32 = arith.constant 478 : i32
    %29 = tpu.dynamic_rotate %0 by %c478_i32 dim 1 : vector<8x512xf32>, i32 -> vector<8x512xf32>
    %c8 = arith.constant 8 : index
    %c0_9 = arith.constant 0 : index
    %30 = vector.load %arg4[%c8, %c0_9] : memref<9x512xf32, #tpu.memory_space<vmem>>, vector<1x512xf32>
    %31 = vector.broadcast %30 : vector<1x512xf32> to vector<8x512xf32>
    %32 = arith.mulf %29, %31 : vector<8x512xf32>
    %33 = tpu.concatenate %4, %8, %12, %16, %0, %20, %24, %28, %32 in 0 : vector<8x512xf32>, vector<8x512xf32>, vector<8x512xf32>, vector<8x512xf32>, vector<8x512xf32>, vector<8x512xf32>, vector<8x512xf32>, vector<8x512xf32>, vector<8x512xf32> -> vector<72x512xf32>
    %c0_10 = arith.constant 0 : index
    %c0_11 = arith.constant 0 : index
    %34 = vector.load %arg3[%c0_10, %c0_11] : memref<8x72xf32, #tpu.memory_space<vmem>>, vector<8x72xf32>
    %cst = arith.constant dense<0.000000e+00> : vector<8x512xf32>
    %35 = tpu.matmul %34, %33, %cst {dimension_numbers = #tpu.dot_dimension_numbers<[1], [0], [0], [1], [0, 0, 1, 1], [], []>} : vector<8x72xf32>, vector<72x512xf32>, vector<8x512xf32> -> vector<8x512xf32>
    %c0_12 = arith.constant 0 : index
    %c0_13 = arith.constant 0 : index
    %36 = vector.load %arg5[%c0_12, %c0_13] : memref<8x512xf32, #tpu.memory_space<vmem>>, vector<8x512xf32>
    tpu.vector_store %arg5[%c0_12, %c0_13], %35 {strides = array<i32>} : memref<8x512xf32, #tpu.memory_space<vmem>>, vector<8x512xf32>,
    return
  }
  func.func @transform_0(%arg0: i32, %arg1: i32) -> (i32, i32) {
    %c0_i32 = arith.constant 0 : i32
    %c0_i32_0 = arith.constant 0 : i32
    return %c0_i32, %arg0 : i32, i32
  }
  func.func @transform_1(%arg0: i32, %arg1: i32) -> (i32, i32) {
    %c0_i32 = arith.constant 0 : i32
    %c0_i32_0 = arith.constant 0 : i32
    return %arg1, %c0_i32 : i32, i32
  }
  func.func @transform_2(%arg0: i32, %arg1: i32) -> (i32, i32) {
    %c0_i32 = arith.constant 0 : i32
    %c0_i32_0 = arith.constant 0 : i32
    %c0_i32_1 = arith.constant 0 : i32
    return %c0_i32, %c0_i32_0 : i32, i32
  }
  func.func @transform_3(%arg0: i32, %arg1: i32) -> (i32, i32) {
    %c0_i32 = arith.constant 0 : i32
    return %arg1, %arg0 : i32, i32
  }
}

</mosaic_0001>

<bundles_post_ra>
// kernel: tpu_custom_call.1
= control target key start
LH: loop header
LB: loop body
LE: loop exit
PB: predicated region body
PF: predicated region fallthrough
CT: control target
= control target key end

     0   :  { %8 = vsyncpa [#allocation3], 0  ;;  %s1342_s0 = inlined_call_operand.hbm [shape: f32[8,1024], index: 0, kind: input, shape index: {}]   ;;  %s1343_s1 = inlined_call_operand.hbm [shape: f32[8,72], index: 1, kind: input, shape index: {}]   ;;  %s1344_s2 = inlined_call_operand.hbm [shape: f32[9,512], index: 2, kind: input, shape index: {}]   ;;  %s1345_s3 = inlined_call_operand.hbm [shape: f32[8,1024], index: 3, kind: output, shape index: {}]  }
   0x1   :  { %10 = vsyncpa [#allocation3 + $0x1], 0 }
   0x2   :  { %11 = vsyncpa [#allocation6], 0 }
   0x3   :  { %12 = vsyncpa [#allocation4], 0 }
   0x4   :  { %14 = vsyncpa [#allocation4 + $0x1], 0  ;;  %s1010_s12 = smov 0   ;;  %s1012_s13 = smov 0  }
   0x5   :  { %s1014_s14 = smov 0   ;;  %s1016_s15 = smov 0  }
   0x6   :  { %s1018_s16 = smov 0   ;;  %s1020_s17 = smov 0  }
   0x7 LB: > { %s682_s18 = sadd.s32 4294967295, %s976_s17   ;;  %s683_s19 = sadd.s32 4294967294, %s976_s17   ;;  %s976_s17 = sphi %s1020_s17, %s20_s17   ;;  %s972_s16 = sphi %s1018_s16, %s1355_s16   ;;  %s968_s15 = sphi %s1016_s15, %s1354_s15   ;;  %s964_s14 = sphi %s1014_s14, %s1353_s14   ;;  %s960_s13 = sphi %s1012_s13, %s1352_s13   ;;  %s956_s12 = sphi %s1010_s12, %s1351_s12  }
   0x8   : > { %p52_p0 = scmp.ne.s32.totalorder %s960_s13, %s956_s12  ;;  %p1046_p1 = scmp.eq.s32.totalorder %s682_s18, 0 }
   0x9   : > { %p131_p2 = scmp.eq.s32.totalorder %s683_s19, 1  ;;  %p684_p4 = scmp.ge.s32.totalorder %s976_s17, 1 }
   0xa   : > { %p1052_p3 = por %p1046_p1, %p52_p0  ;;  %p138_p6 = scmp.lt.s32.totalorder %s976_s17, 3 }
   0xb   : > { %p1057_p5 = por %p131_p2, %p52_p0  ;;  %s152_s25 = sshll.u32 %s1343_s1, 4  ;;  %s153_s25 = int_to_ptr.hbm [resolvable:$true] %s152_s25 }
   0xc   : > { %p1065_p7 = pnand %p684_p4, %p138_p6  ;;  %p687_p8 = scmp.ge.s32.totalorder %s976_s17, 2 }
   0xd   : > { %s978_s27 = smov [#allocation5]   ;;  %s163_s4 = sshll.u32 %s1344_s2, 4  ;;  %s164_s4 = int_to_ptr.hbm [resolvable:$true] %s163_s4 }
   0xe   : > { %p719_p9 = pneg %p1065_p7  ;;  %s154_s28 = sshll.u32 %s978_s27, 4  ;;  %s155_s28 = int_to_ptr.vmem [resolvable:$true] %s154_s28 }
   0xf   : > { %s979_s5 = smov [#allocation7]   ;;  %s980_s7 = smov 512  }
  0x10   : > { %p720_p10 = pnand %p719_p9, %p1046_p1  ;;  %s165_s6 = sshll.u32 %s979_s5, 4  ;;  %s166_s6 = int_to_ptr.vmem [resolvable:$true] %s165_s6 }
  0x11   : > { %s981_s8 = smov 32   ;;  %p125_p11 = scmp.eq.s32.totalorder %s682_s18, 1 }
  0x12   : > { %722 = dma.hbm_to_vmem [thread:$0]  (!%p720_p10), %s153_s25, 128, %s155_s28, [#allocation6]  }
  0x13   : > { %725 = dma.hbm_to_vmem [thread:$0]  (!%p720_p10), %s164_s4, 1024, %s166_s6, [#allocation6], %s980_s7, %s980_s7, %s981_s8  }
  0x14   : > { %s32_s9 = sadd.s32 1, %s972_s16  ;;  %s39_s10 = sadd.s32 1, %s964_s14 }
  0x15   : > { %p34_p12 = scmp.ge.s32.totalorder %s32_s9, 2  ;;  %p46_p13 = scmp.ne.s32.totalorder %s964_s14, %s960_s13 }
  0x16   : > { %p47_p0 = scmp.eq.s32.totalorder %s976_s17, 0  ;;  %p736_p4 = scmp.lt.s32.totalorder %s976_s17, 2 }
  0x17   : > { %s1357_s9 = smov (%p34_p12, %s32_s9), 0  ;;  %p1086_p2 = por %p125_p11, %p46_p13 }
  0x18   : > { %s36_s19 = ssub.s32 %s972_s16, %s1357_s9  ;;  %s179_s23 = sand.u32 1, %s964_s14  }
  0x19   : > { %p37_p6 = scmp.eq.s32.totalorder %s36_s19, 0  ;;  %p48_p9 = por %p47_p0, %p46_p13 }
  0x1a   : > { %s688_s24 = sshll.u32 %s179_s23, 5  ;;  %s705_s18 = sshll.u32 %s972_s16, 5 }
  0x1b   : > { %s1096_s25 = scalar_select %p37_p6, %s964_s14, %s39_s10  }
  0x1c   : > { %s188_s29 = scalar_lea.hbm %s1342_s0, %s705_s18  ;;  %s183_s4 = scalar_lea.vmem [#allocation2], %s688_s24 }
  0x1d   : > { %s190_s30 = sshll.u32 %s188_s29, 4  ;;  %s192_s5 = sshll.u32 %s183_s4, 4  ;;  %s191_s30 = int_to_ptr.hbm [resolvable:$true] %s190_s30  ;;  %s193_s5 = int_to_ptr.vmem [resolvable:$true] %s192_s5 }
  0x1e   : > { %p727_p10 = pnand %p736_p4, %p48_p9  ;;  %s180_s6 = scalar_lea.sflag [#allocation3], %s179_s23 }
  0x1f   : > { %201 = sbr.rel (%p1065_p7) target bundleno = 372 (0x174), region = 32  ;;  %s1106_s7 = sand.u32 (!%p1065_p7), 1, %s960_s13  }
  0x20   : > { %729 = dma.hbm_to_vmem [thread:$0]  (!%p727_p10), %s191_s30, 512, %s193_s5, %s180_s6  }
  0x21   : > { %s692_s8 = sshll.u32 (!%p1065_p7), %s1106_s7, 5  ;;  %s204_s10 = scalar_lea.sflag (!%p1065_p7), [#allocation3], %s1106_s7 }
  0x22   : > { %s207_s19 = scalar_lea.vmem (!%p1065_p7), [#allocation2], %s692_s8 }
  0x24   : > { %943 = dma.done.wait (%p1052_p3), %s204_s10, 512  }
  0x25   : > { %945 = vsyncadd (%p1052_p3), %s204_s10, 4294966784 }
  0x26   : > { %947 = dma.done.wait (%p1046_p1), [#allocation6], 1152  }
  0x27   : > { %949 = vsyncadd (%p1046_p1), [#allocation6], 4294966144  ;;  %v1120_v0 = vld [vmem:[%s207_s19 + $0x18] sm:$0xff]  ;;  %v1122_v1 = vld [vmem:[%s207_s19 + $0x10] sm:$0xff]  ;;  %s982_s26 = smov 94   ;;  %s983_s23 = smov 96   ;;  %v255_v6 = vlaneseq }
  0x28   : > { %v1124_v2 = vld [vmem:[%s207_s19] sm:$0xff]  ;;  %450 = vrot.lane.b32.xlu1 %v1120_v0, %s982_s26  ;;  %420 = vrot.lane.b32.xlu2 %v1122_v1, %s983_s23  ;;  %s984_s20 = smov 98   ;;  %s985_s21 = smov 126   ;;  %v1138_v3 = vld [vmem:[%s207_s19 + $0x8] sm:$0xff]  ;;  %vm473_vm8 = vcmask 588800  }
  0x29   : > { %444 = vrot.lane.b32.xlu0 %v1124_v2, %s982_s26  ;;  %s986_s24 = smov 2   ;;  %s987_s18 = smov 30   ;;  %v1162_v7 = vand.u32 127, %v255_v6  ;;  %v1164_v8 = vld [vmem:[#allocation7 + $0x20] ss:$8 sm:$0xf] }
  0x2a   : > { %s988_s27 = smov 32   ;;  %s989_s28 = smov 34   ;;  %v463_v9 = vperm.slane %v1164_v8, 3  ;;  %v1170_v15 = vld [vmem:[#allocation7 + $0x7] ss:$8 sm:$0xf] }
  0x2b   : > { %vm452_vm0 = vcmp.lt.s32.totalorder %v1162_v7, 94  ;;  %v435_v16 = vperm.slane %v1170_v15, 3  ;;  %vm424_vm1 = vcmp.lt.s32.totalorder %v1162_v7, 96  ;;  %v462_v17 = vperm.slane %v1164_v8, 2  ;;  %s240_s29 = scalar_lea.vmem [#allocation8], %s692_s8  ;;  %s706_s30 = sshll.u32 %s968_s15, 5 }
  0x2c   : > { %v434_v21 = vperm.slane %v1170_v15, 2  ;;  %v402_v27 = vld [vmem:[#allocation7 + $0x6] ss:$8 sm:$0xf]  ;;  %vm396_vm2 = vcmp.lt.s32.totalorder %v1162_v7, 98  ;;  %vm368_vm3 = vcmp.lt.s32.totalorder %v1162_v7, 126  ;;  %s575_s6 = scalar_lea.hbm %s1345_s3, %s706_s30 }
  0x2d   : > { %v406_v29 = vperm.slane %v402_v27, 2  ;;  %v407_v30 = vperm.slane %v402_v27, 3  ;;  %v1190_v38 = vld [vmem:[#allocation7 + $0x5] ss:$8 sm:$0xf]  ;;  %v460_v48 = vperm.slane %v1164_v8, 0 }
  0x2e   : > { %v378_v39 = vperm.slane %v1190_v38, 2  ;;  %v379_v40 = vperm.slane %v1190_v38, 3  ;;  %v461_v49 = vperm.slane %v1164_v8, 1  ;;  %v432_v52 = vperm.slane %v1170_v15, 0  ;;  %s577_s10 = sshll.u32 %s240_s29, 4  ;;  %s579_s19 = sshll.u32 %s575_s6, 4  ;;  %s578_s10 = int_to_ptr.vmem [resolvable:$true] %s577_s10  ;;  %s580_s19 = int_to_ptr.hbm [resolvable:$true] %s579_s19 }
  0x2f   : > { %v433_v53 = vperm.slane %v1170_v15, 1  ;;  %v404_v60 = vperm.slane %v402_v27, 0  ;;  %v405_v61 = vperm.slane %v402_v27, 1  ;;  %vm340_vm4 = vcmp.lt.s32.totalorder %v1162_v7, 2 }
  0x30   : > { %422 = vrot.lane.b32.xlu2 %v1120_v0, %s983_s23  ;;  %416 = vrot.lane.b32.xlu1 %v1124_v2, %s983_s23  ;;  %vm312_vm5 = vcmp.lt.s32.totalorder %v1162_v7, 30  ;;  %v1249_v27 = vld [vmem:[#allocation7 + $0x1] ss:$8 sm:$0xf]  ;;  %vm284_vm6 = vcmp.lt.s32.totalorder %v1162_v7, 32  ;;  %vm257_vm7 = vcmp.lt.s32.totalorder %v1162_v7, 34 }
  0x31   : > { %448 = vrot.lane.b32.xlu0 %v1122_v1, %s982_s26 }
  0x38   : > { %394 = vrot.lane.b32.xlu2 %v1120_v0, %s984_s20  ;;  %392 = vrot.lane.b32.xlu1 %v1122_v1, %s984_s20 }
  0x39   : > { %388 = vrot.lane.b32.xlu0 %v1124_v2, %s984_s20 }
  0x40   : > { %366 = vrot.lane.b32.xlu2 %v1120_v0, %s985_s21  ;;  %364 = vrot.lane.b32.xlu1 %v1122_v1, %s985_s21 }
  0x41   : > { %360 = vrot.lane.b32.xlu0 %v1124_v2, %s985_s21 }
  0x48   : > { %334 = vrot.lane.b32.xlu2 %v1138_v3, %s986_s24  ;;  %418 = vrot.lane.b32.xlu1 %v1138_v3, %s983_s23  ;;  %s904_s23 = sshra.s32 %s580_s19, 4  ;;  %s905_s23 = int_to_ptr.hbm [resolvable:$true] %s904_s23 }
  0x49   : > { %446 = vrot.lane.b32.xlu0 %v1138_v3, %s982_s26  ;;  %s562_s26 = scalar_lea.sflag [#allocation4], %s1106_s7  ;;  %s906_s8 = scalar_lea.hbm %s905_s23, 32 }
  0x4a   : > { %p907_p1 = scmp.ne.s32.totalorder %s905_s23, %s906_s8  ;;  %p911_p11 = scmp.lt.s32.totalorder %s905_s23, %s1345_s3 }
  0x4c   : > { %p908_p3 = pnand %p907_p1, %p1086_p2 }
  0x4e   : > { %p909_p7 = pneg %p908_p3 }
  0x50   : > { %390 = vrot.lane.b32.xlu2 %v1138_v3, %s984_s20  ;;  %338 = vrot.lane.b32.xlu1 %v1120_v0, %s986_s24 }
  0x51   : > { %336 = vrot.lane.b32.xlu0 %v1122_v1, %s986_s24 }
  0x58   : > { %310 = vrot.lane.b32.xlu2 %v1120_v0, %s987_s18  ;;  %308 = vrot.lane.b32.xlu1 %v1122_v1, %s987_s18 }
  0x59   : > { %306 = vrot.lane.b32.xlu0 %v1138_v3, %s987_s18 }
  0x60   : > { %280 = vrot.lane.b32.xlu2 %v1122_v1, %s988_s27  ;;  %278 = vrot.lane.b32.xlu1 %v1138_v3, %s988_s27 }
  0x61   : > { %362 = vrot.lane.b32.xlu0 %v1138_v3, %s985_s21  ;;  %s910_s21 = scalar_lea.hbm %s1345_s3, 64 }
  0x62   : > { %p912_p12 = scmp.lt.s32.totalorder %s910_s21, %s906_s8 }
  0x64   : > { %p913_p13 = por %p912_p12, %p911_p11 }
  0x66   : > { %p914_p0 = pnand %p913_p13, %p909_p7 }
  0x68   : > { %251 = vrot.lane.b32.xlu2 %v1122_v1, %s989_s28  ;;  %249 = vrot.lane.b32.xlu1 %v1138_v3, %s989_s28 }
  0x69   : > { %282 = vrot.lane.b32.xlu0 %v1120_v0, %s988_s27 }
  0x70   : > { %304 = vrot.lane.b32.xlu2 %v1124_v2, %s987_s18  ;;  %332 = vrot.lane.b32.xlu1 %v1124_v2, %s986_s24 }
  0x71   : > { %253 = vrot.lane.b32.xlu0 %v1120_v0, %s989_s28 }
  0x78   : > { %247 = vrot.lane.b32.xlu1 %v1124_v2, %s989_s28 }
  0x79   : > { %276 = vrot.lane.b32.xlu0 %v1124_v2, %s988_s27 }
  0x82   : > { %v1160_v4 = vpop.permute.xlu2 %420 }
  0x8a   : > { %v423_v5 = vpop.permute.xlu2 %422 }
  0x8b   : > { %v425_v22 = vsel %vm424_vm1, %v1160_v4, %v423_v5 }
  0x8c   : > { %v442_v28 = vmul.f32 %v434_v21, %v425_v22 }
  0x92   : > { %v395_v10 = vpop.permute.xlu2 %394 }
  0x9a   : > { %v451_v11 = vpop.permute.xlu1 %450  ;;  %v367_v23 = vpop.permute.xlu2 %366 }
  0x9b   : > { %v445_v12 = vpop.permute.xlu0 %444 }
  0x9c   : > { %v456_v13 = vsel %vm452_vm0, %v451_v11, %v445_v12 }
  0x9d   : > { %v471_v14 = vmul.f32 %v463_v9, %v456_v13 }
  0x9f   : > { %544 = vmatpush.msra.mxu3 %v471_v14 }
  0xa2   : > { %v417_v18 = vpop.permute.xlu1 %416  ;;  %v1188_v37 = vpop.permute.xlu2 %334 }
  0xa3   : > { %v428_v19 = vsel %vm424_vm1, %v423_v5, %v417_v18  ;;  %v449_v20 = vpop.permute.xlu0 %448 }
  0xa4   : > { %v453_v24 = vsel %vm452_vm0, %v449_v20, %v451_v11  ;;  %v443_v25 = vmul.f32 %v435_v16, %v428_v19 }
  0xa5   : > { %v470_v26 = vmul.f32 %v462_v17, %v453_v24  ;;  %v1239_v17 = vld [vmem:[#allocation7 + $0x2] ss:$8 sm:$0xf] }
  0xa6   : > { %545 = vmatpush.msra.mxu3 %v443_v25  ;;  %v322_v19 = vperm.slane %v1239_v17, 2 }
  0xa7   : > { %524 = vmatpush.msra.mxu2 %v470_v26 }
  0xa9   : > { %525 = vmatpush.msra.mxu2 %v442_v28  ;;  %v294_v28 = vperm.slane %v1249_v27, 2 }
  0xaa   : > { %v393_v31 = vpop.permute.xlu1 %392  ;;  %v391_v47 = vpop.permute.xlu2 %390 }
  0xab   : > { %v397_v32 = vsel %vm396_vm2, %v393_v31, %v395_v10  ;;  %v389_v33 = vpop.permute.xlu0 %388  ;;  %v398_v62 = vsel %vm396_vm2, %v391_v47, %v393_v31 }
  0xac   : > { %v400_v34 = vsel %vm396_vm2, %v395_v10, %v389_v33  ;;  %v414_v35 = vmul.f32 %v406_v29, %v397_v32  ;;  %v399_v63 = vsel %vm396_vm2, %v389_v33, %v391_v47  ;;  %v413_v6 = vmul.f32 %v405_v61, %v398_v62 }
  0xad   : > { %v415_v36 = vmul.f32 %v407_v30, %v400_v34  ;;  %v412_v5 = vmul.f32 %v404_v60, %v399_v63  ;;  %v376_v29 = vperm.slane %v1190_v38, 0  ;;  %v377_v30 = vperm.slane %v1190_v38, 1 }
  0xae   : > { %526 = vmatpush.msra.mxu2 %v414_v35 }
  0xaf   : > { %546 = vmatpush.msra.mxu3 %v415_v36 }
  0xb2   : > { %v1195_v41 = vpop.permute.xlu1 %364  ;;  %v1229_v10 = vpop.permute.xlu2 %310 }
  0xb3   : > { %v369_v42 = vsel %vm368_vm3, %v1195_v41, %v367_v23  ;;  %v1200_v43 = vpop.permute.xlu0 %360 }
  0xb4   : > { %v372_v44 = vsel %vm368_vm3, %v367_v23, %v1200_v43  ;;  %v386_v45 = vmul.f32 %v378_v39, %v369_v42  ;;  %v262_v42 = vld [vmem:[#allocation7] ss:$8 sm:$0xf] }
  0xb5   : > { %v387_v46 = vmul.f32 %v379_v40, %v372_v44  ;;  %v266_v38 = vperm.slane %v262_v42, 2 }
  0xb6   : > { %527 = vmatpush.msra.mxu2 %v386_v45  ;;  %v295_v45 = vperm.slane %v1249_v27, 3 }
  0xb7   : > { %547 = vmatpush.msra.mxu3 %v387_v46 }
  0xb8   : > { %528 = vmatpush.msra.mxu2 %v1122_v1 }
  0xb9   : > { %548 = vmatpush.msra.mxu3 %v1120_v0  ;;  %v1224_v0 = vld [vmem:[#allocation7 + $0x3] ss:$8 sm:$0xf] }
  0xba   : > { %v419_v50 = vpop.permute.xlu1 %418  ;;  %v350_v8 = vperm.slane %v1224_v0, 2  ;;  %v351_v9 = vperm.slane %v1224_v0, 3  ;;  %v281_v23 = vpop.permute.xlu2 %280 }
  0xbb   : > { %v447_v51 = vpop.permute.xlu0 %446  ;;  %v426_v54 = vsel %vm424_vm1, %v419_v50, %v1160_v4  ;;  %v427_v55 = vsel %vm424_vm1, %v417_v18, %v419_v50  ;;  %v323_v18 = vperm.slane %v1239_v17, 3 }
  0xbc   : > { %v455_v56 = vsel %vm452_vm0, %v445_v12, %v447_v51  ;;  %v454_v57 = vsel %vm452_vm0, %v447_v51, %v449_v20  ;;  %v440_v1 = vmul.f32 %v432_v52, %v427_v55  ;;  %v441_v4 = vmul.f32 %v433_v53, %v426_v54 }
  0xbd   : > { %v468_v58 = vmul.f32 %v460_v48, %v455_v56  ;;  %v469_v59 = vmul.f32 %v461_v49, %v454_v57  ;;  %v472_v49 = vld [vmem:[#allocation5] sm:$0xff]  ;;  %v267_v52 = vperm.slane %v262_v42, 3  ;;  %v320_v54 = vperm.slane %v1239_v17, 0 }
  0xbe   : > { %v321_v55 = vperm.slane %v1239_v17, 1 }
  0xbf   : > { %484 = vmatpush.msra.mxu0 %v468_v58  ;;  %504 = vmatpush.msra.mxu1 %v469_v59 }
  0xc1   : > { %485 = vmatpush.msra.mxu0 %v440_v1  ;;  %505 = vmatpush.msra.mxu1 %v441_v4 }
  0xc2   : > { %v1231_v11 = vpop.permute.xlu1 %338  ;;  %v252_v44 = vpop.permute.xlu2 %251 }
  0xc3   : > { %486 = vmatpush.msra.mxu0 %v412_v5  ;;  %506 = vmatpush.msra.mxu1 %v413_v6  ;;  %v337_v12 = vpop.permute.xlu0 %336  ;;  %v293_v5 = vperm.slane %v1249_v27, 1 }
  0xc4   : > { %v341_v13 = vsel %vm340_vm4, %v337_v12, %v1231_v11  ;;  %v342_v14 = vsel %vm340_vm4, %v1188_v37, %v337_v12 }
  0xc5   : > { %v358_v15 = vmul.f32 %v350_v8, %v342_v14  ;;  %v359_v16 = vmul.f32 %v351_v9, %v341_v13  ;;  %v264_v9 = vperm.slane %v262_v42, 0 }
  0xc7   : > { %529 = vmatpush.msra.mxu2 %v358_v15  ;;  %549 = vmatpush.msra.mxu3 %v359_v16 }
  0xca   : > { %v309_v20 = vpop.permute.xlu1 %308  ;;  %v305_v51 = vpop.permute.xlu2 %304 }
  0xcb   : > { %v313_v21 = vsel %vm312_vm5, %v309_v20, %v1229_v10  ;;  %v307_v22 = vpop.permute.xlu0 %306  ;;  %v316_v56 = vsel %vm312_vm5, %v1229_v10, %v305_v51  ;;  %v265_v10 = vperm.slane %v262_v42, 1 }
  0xcc   : > { %v314_v24 = vsel %vm312_vm5, %v307_v22, %v309_v20  ;;  %v331_v25 = vmul.f32 %v323_v18, %v313_v21  ;;  %v315_v57 = vsel %vm312_vm5, %v305_v51, %v307_v22  ;;  %v328_v1 = vmul.f32 %v320_v54, %v316_v56 }
  0xcd   : > { %v330_v26 = vmul.f32 %v322_v19, %v314_v24  ;;  %v329_v4 = vmul.f32 %v321_v55, %v315_v57 }
  0xce   : > { %550 = vmatpush.msra.mxu3 %v331_v25 }
  0xcf   : > { %530 = vmatpush.msra.mxu2 %v330_v26 }
  0xd2   : > { %v279_v31 = vpop.permute.xlu1 %278 }
  0xd3   : > { %v286_v32 = vsel %vm284_vm6, %v279_v31, %v281_v23  ;;  %v363_v33 = vpop.permute.xlu0 %362 }
  0xd4   : > { %v370_v34 = vsel %vm368_vm3, %v363_v33, %v1195_v41  ;;  %v371_v35 = vsel %vm368_vm3, %v1200_v43, %v363_v33  ;;  %v302_v36 = vmul.f32 %v294_v28, %v286_v32 }
  0xd5   : > { %v384_v39 = vmul.f32 %v376_v29, %v371_v35  ;;  %v385_v40 = vmul.f32 %v377_v30, %v370_v34 }
  0xd6   : > { %531 = vmatpush.msra.mxu2 %v302_v36 }
  0xd7   : > { %487 = vmatpush.msra.mxu0 %v384_v39  ;;  %507 = vmatpush.msra.mxu1 %v385_v40 }
  0xd9   : > { %488 = vmatpush.msra.mxu0 %v1124_v2  ;;  %508 = vmatpush.msra.mxu1 %v1138_v3  ;;  %v348_v2 = vperm.slane %v1224_v0, 0  ;;  %v349_v3 = vperm.slane %v1224_v0, 1 }
  0xda   : > { %v250_v41 = vpop.permute.xlu1 %249 }
  0xdb   : > { %v259_v43 = vsel %vm257_vm7, %v250_v41, %v252_v44  ;;  %v283_v46 = vpop.permute.xlu0 %282 }
  0xdc   : > { %v285_v47 = vsel %vm284_vm6, %v281_v23, %v283_v46  ;;  %v274_v48 = vmul.f32 %v266_v38, %v259_v43 }
  0xdd   : > { %v303_v50 = vmul.f32 %v295_v45, %v285_v47 }
  0xde   : > { %532 = vmatpush.msra.mxu2 %v274_v48 }
  0xdf   : > { %551 = vmatpush.msra.mxu3 %v303_v50  ;;  %698 = vmatmul.msk.f32.vlgmr.msra.gmra.mxu2 %vm473_vm8, %v472_v49 }
  0xe2   : > { %v333_v53 = vpop.permute.xlu1 %332 }
  0xe3   : > { %v343_v58 = vsel %vm340_vm4, %v333_v53, %v1188_v37  ;;  %v344_v59 = vsel %vm340_vm4, %v1231_v11, %v333_v53  ;;  %v254_v60 = vpop.permute.xlu0 %253  ;;  %v292_v37 = vperm.slane %v1249_v27, 0 }
  0xe4   : > { %v258_v61 = vsel %vm257_vm7, %v252_v44, %v254_v60  ;;  %v356_v62 = vmul.f32 %v348_v2, %v344_v59  ;;  %v357_v63 = vmul.f32 %v349_v3, %v343_v58 }
  0xe5   : > { %v275_v0 = vmul.f32 %v267_v52, %v258_v61 }
  0xe6   : > { %489 = vmatpush.msra.mxu0 %v356_v62  ;;  %509 = vmatpush.msra.mxu1 %v357_v63 }
  0xe7   : > { %552 = vmatpush.msra.mxu3 %v275_v0 }
  0xe8   : > { %490 = vmatpush.msra.mxu0 %v328_v1  ;;  %510 = vmatpush.msra.mxu1 %v329_v4 }
  0xe9   : > { %699 = vmatmul.msk.f32.vlgmr.msra.gmra.mxu3 %vm473_vm8, %v472_v49 }
  0xea   : > { %v248_v6 = vpop.permute.xlu1 %247 }
  0xeb   : > { %v277_v8 = vpop.permute.xlu0 %276  ;;  %v260_v11 = vsel %vm257_vm7, %v248_v6, %v250_v41  ;;  %v261_v12 = vsel %vm257_vm7, %v254_v60, %v248_v6 }
  0xec   : > { %v287_v13 = vsel %vm284_vm6, %v277_v8, %v279_v31  ;;  %v288_v14 = vsel %vm284_vm6, %v283_v46, %v277_v8  ;;  %v272_v17 = vmul.f32 %v264_v9, %v261_v12  ;;  %v273_v18 = vmul.f32 %v265_v10, %v260_v11 }
  0xed   : > { %v300_v15 = vmul.f32 %v292_v37, %v288_v14  ;;  %v301_v16 = vmul.f32 %v293_v5, %v287_v13 }
  0xef   : > { %491 = vmatpush.msra.mxu0 %v300_v15  ;;  %511 = vmatpush.msra.mxu1 %v301_v16 }
  0xf1   : > { %492 = vmatpush.msra.mxu0 %v272_v17  ;;  %512 = vmatpush.msra.mxu1 %v273_v18 }
  0xf2   : > { %696 = vmatmul.msk.f32.vlgmr.msra.gmra.mxu0 %vm473_vm8, %v472_v49  ;;  %697 = vmatmul.msk.f32.vlgmr.msra.gmra.mxu1 %vm473_vm8, %v472_v49 }
 0x162   : > { %v534_v19 = vpop.f32.mrf.mxu2 }
 0x163   : > { %559 = vst [vmem:[%s240_s29 + $0x10] sm:$0xff] %v534_v19 }
 0x16c   : > { %v554_v7 = vpop.f32.mrf.mxu3 }
 0x16d   : > { %560 = vst [vmem:[%s240_s29 + $0x18] sm:$0xff] %v554_v7 }
 0x16f   : > { %v494_v20 = vpop.f32.mrf.mxu0  ;;  %v514_v21 = vpop.f32.mrf.mxu1 }
 0x170   : > { %557 = vst [vmem:[%s240_s29] sm:$0xff] %v494_v20 }
 0x171   : > { %558 = vst [vmem:[%s240_s29 + $0x8] sm:$0xff] %v514_v21 }
 0x172   : > { %917 = shalt.err (!%p914_p0)
}
 0x173   : > { %717 = dma.vmem_to_hbm [thread:$0]  (%p1086_p2), %s578_s10, 512, %s580_s19, %s562_s26  }
 0x174 PF: > { %s591_s7 = sand.u32 1, %s956_s12   ;;  %p731_p4 = pnand %p687_p8, %p1057_p5 }
 0x175   : > { %s592_s27 = scalar_lea.sflag [#allocation4], %s591_s7 }
 0x176   : > { %p732_p6 = pneg %p731_p4 }
 0x178   : > { %951 = dma.done.wait (%p732_p6), %s592_s27, 512  }
 0x179   : > { %953 = vsyncadd (%p732_p6), %s592_s27, 4294966784  ;;  %s20_s17 = sadd.s32 1, %s976_s17   ;;  %s1351_s12 = smov %s960_s13 }
 0x17a   : > { %p17_p9 = scmp.ge.s32.totalorder %s20_s17, 4   ;;  %s1352_s13 = smov %s964_s14 }
 0x17b   : > { %s1353_s14 = smov %s1096_s25  ;;  %s1354_s15 = smov %s972_s16 }
 0x17c   : > { %s1355_s16 = smov %s1357_s9  ;;  %19 = sbr.rel (!%p17_p9) target bundleno = 7 (0x7), region = 93 }
 0x181   :  { %598 = vsyncpa [#allocation3], 1 }
 0x182   :  { %600 = vsyncpa [#allocation3 + $0x1], 1 }
 0x183   :  { %601 = vsyncpa [#allocation6], 1 }
 0x184   :  { %602 = vsyncpa [#allocation4], 1 }
 0x185   :  { %604 = vsyncpa [#allocation4 + $0x1], 1 }

</bundles_post_ra>
